<compile_context>
chip_gen: v7x
topology: tpu7x:2x2x1
jax: 0.10.0
libtpu: 0.0.40
codegen_flags: <defaults>
</compile_context>

<pallas_src>
import functools

import jax
import jax.numpy as jnp
from jax.experimental import pallas as pl
from jax.experimental.pallas import tpu as pltpu


def _round_up(x, m):
    return (x + m - 1) // m * m


def _cdiv(a, b):
    return (a + b - 1) // b


def _nb_decoder_kernel(scale_ref, x_ref, w_ref,
                       norm_ref, disper_ref, scalex_ref,
                       *, f_out_pad, f_out_valid):
    x = x_ref[...]                                              # (TB, F_in) compute dtype
    w = w_ref[...]                                              # (F_in, 2*F_out_pad)

    # One fused MXU pass over [feature | disper] -> (TB, 2*F_out_pad) f32 accumulate.
    logits = jnp.dot(x, w, preferred_element_type=jnp.float32)

    if f_out_valid < f_out_pad:
        # Single mask pass over the combined logits: padded lanes in either half
        # pushed to a large negative so they vanish from max/sum.
        lane = jax.lax.broadcasted_iota(jnp.int32, logits.shape, 1)
        lane_in_half = jnp.where(lane < f_out_pad, lane, lane - f_out_pad)
        logits = jnp.where(lane_in_half >= f_out_valid, jnp.float32(-1e30), logits)

    lf = logits[:, :f_out_pad]            # lane-aligned slices (f_out_pad % 128 == 0)
    ld = logits[:, f_out_pad:]

    # normalized = softmax(x @ feature, axis=-1)
    m_f = jnp.max(lf, axis=-1, keepdims=True)
    e_f = jnp.exp(lf - m_f)
    norm = e_f * pl.reciprocal(jnp.sum(e_f, axis=-1, keepdims=True), approx=True)
    norm_ref[...] = norm.astype(norm_ref.dtype)

    # scale_x = exp(scale_factor) * normalized  (exp precomputed in wrapper, SMEM scalar)
    scalex_ref[...] = (scale_ref[0, 0] * norm).astype(scalex_ref.dtype)

    # disperation = exp(softmax(x @ disper, axis=-1))
    m_d = jnp.max(ld, axis=-1, keepdims=True)
    e_d = jnp.exp(ld - m_d)
    soft_d = e_d * pl.reciprocal(jnp.sum(e_d, axis=-1, keepdims=True), approx=True)
    disper_ref[...] = jnp.exp(soft_d).astype(disper_ref.dtype)


def nb_data_decoder(x, feature, disper, scale_factor=1.0, *,
                    compute_dtype=jnp.bfloat16,
                    out_dtype=jnp.float32,
                    return_padded=False):
    """x: (B, F_in); feature/disper: (F_in, F_out). Returns dict of (B, F_out) arrays.

    compute_dtype: dtype of the MXU operands (bf16 default; accumulation stays f32).
    out_dtype:     dtype of the three output streams (f32 default; bf16 halves write BW).
    return_padded: if True, return the padded (B_pad, F_out_pad) arrays and skip the
                   post-kernel slice copies (valid region is [:B, :F_out]).
    """
    B, F_in = x.shape
    F_out = feature.shape[1]
    assert F_out >= 1, "out_features must be >= 1 (softmax over an empty axis)"

    x_bytes = jnp.dtype(compute_dtype).itemsize
    out_bytes = jnp.dtype(out_dtype).itemsize

    # --- lane-dense output axis: pad F_out to a multiple of 128 ---
    F_out_pad = _round_up(F_out, 128)
    if F_out_pad != F_out:
        pad = F_out_pad - F_out
        feature = jnp.pad(feature, ((0, 0), (0, pad)))
        disper = jnp.pad(disper, ((0, 0), (0, pad)))
    w = jnp.concatenate([feature, disper], axis=1).astype(compute_dtype)  # (F_in, 2*F_out_pad)
    x = x.astype(compute_dtype)

    # --- generation-aware VMEM budgets ---
    try:
        vmem_cap = int(pltpu.get_tpu_info().vmem_capacity_bytes)
    except Exception:
        vmem_cap = 64 * 2**20                      # conservative (v7x-sized) fallback
    small_vmem = vmem_cap <= 64 * 2**20
    tile_budget = (40 if small_vmem else 88) * 2**20
    vmem_limit_cap = (48 if small_vmem else 112) * 2**20

    # --- batch tile sizing (mem-bound kernel: biggest tile that fits the budget) ---
    # Per-row VMEM: double-buffered x, double-buffered 3 output streams, plus f32
    # compiler temporaries (combined logits + exp/softmax intermediates ~ 7 * F_out_pad).
    per_row_bytes = (2 * F_in * x_bytes
                     + 2 * 3 * F_out_pad * out_bytes
                     + 7 * F_out_pad * 4)
    weight_vmem = F_in * 2 * F_out_pad * x_bytes   # single-buffered resident weights
    row_align = 8 if (x_bytes == 4 and out_bytes == 4) else 16

    avail = max(tile_budget - weight_vmem, per_row_bytes * row_align)
    TB = int(min(1024, avail // per_row_bytes))
    TB = max(row_align, (TB // row_align) * row_align)
    if TB >= B:
        # Whole batch fits in one tile: split in two when possible so both v7x
        # TensorCores get work (harmless single extra grid step on v5e/v6e).
        if B >= 2 * row_align:
            TB = _round_up(_cdiv(B, 2), row_align)
        else:
            TB = _round_up(B, row_align)
    B_pad = _round_up(B, TB)
    if B_pad != B:
        x = jnp.pad(x, ((0, B_pad - B), (0, 0)))
    n_tiles = B_pad // TB

    # exp(scale) hoisted out of the kernel; lives in SMEM.
    exp_scale = jnp.exp(jnp.asarray(scale_factor, jnp.float32)).reshape(1, 1)

    # Explicit VMEM limit (weights budgeted at 2x in case the single-buffer
    # pipeline_mode is unavailable and we fall back to default double-buffering).
    vmem_bytes = 2 * weight_vmem + TB * per_row_bytes
    vmem_limit = int(min(vmem_limit_cap, max(16 * 2**20, int(vmem_bytes * 1.25))))

    out_shape = tuple(jax.ShapeDtypeStruct((B_pad, F_out_pad), out_dtype)
                      for _ in range(3))

    kernel = functools.partial(_nb_decoder_kernel,
                               f_out_pad=F_out_pad, f_out_valid=F_out)

    def _call(weight_spec):
        return pl.pallas_call(
            kernel,
            out_shape=out_shape,
            grid=(n_tiles,),
            in_specs=[
                pl.BlockSpec(memory_space=pltpu.MemorySpace.SMEM),      # exp(scale)
                pl.BlockSpec((TB, F_in), lambda i: (i, 0)),             # x tile
                weight_spec,                                            # resident weights
            ],
            out_specs=tuple(pl.BlockSpec((TB, F_out_pad), lambda i: (i, 0))
                            for _ in range(3)),
            compiler_params=pltpu.CompilerParams(
                dimension_semantics=("parallel",),
                vmem_limit_bytes=vmem_limit,
            ),
        )(exp_scale, x, w)

    try:
        # Grid-invariant weight block: no point double-buffering it.
        wspec = pl.BlockSpec((F_in, 2 * F_out_pad), lambda i: (0, 0),
                             pipeline_mode=pl.Buffered(1))
        normalized, disperation, scale_x = _call(wspec)
    except Exception:
        # Fallback for runtimes without pipeline_mode / Buffered(1) support.
        wspec = pl.BlockSpec((F_in, 2 * F_out_pad), lambda i: (0, 0))
        normalized, disperation, scale_x = _call(wspec)

    if return_padded or (B_pad == B and F_out_pad == F_out):
        # No post-kernel copy: outputs are already exact, or caller accepts padding.
        return dict(normalized=normalized, disperation=disperation, scale_x=scale_x)

    sl_b, sl_f = slice(0, B), slice(0, F_out)
    return dict(normalized=normalized[sl_b, sl_f],
                disperation=disperation[sl_b, sl_f],
                scale_x=scale_x[sl_b, sl_f])


if __name__ == "__main__":
    key = jax.random.PRNGKey(0)
    k_x, k_f, k_d = jax.random.split(key, 3)

    # out_features deliberately not a 128-multiple to exercise the padded/masked path.
    batch, in_features, out_features = 8, 32, 200
    x = jax.random.normal(k_x, (batch, in_features), dtype=jnp.float32)
    feature = jax.random.normal(k_f, (in_features, out_features), dtype=jnp.float32) * 0.1
    disper = jax.random.normal(k_d, (in_features, out_features), dtype=jnp.float32) * 0.1

    out = nb_data_decoder(x, feature, disper, scale_factor=1.0)
    jax.block_until_ready(out)

    assert out["normalized"].shape == (batch, out_features)
    assert out["disperation"].shape == (batch, out_features)
    assert out["scale_x"].shape == (batch, out_features)

    # Matched-precision reference (bf16 MXU operands, f32 accumulation — same path
    # as the kernel); remaining delta is just the approx EUP reciprocal.
    xb = x.astype(jnp.bfloat16)
    lf = jnp.dot(xb, feature.astype(jnp.bfloat16), preferred_element_type=jnp.float32)
    ld = jnp.dot(xb, disper.astype(jnp.bfloat16), preferred_element_type=jnp.float32)
    ref_norm = jax.nn.softmax(lf, axis=1)
    ref_scale = jnp.exp(jnp.float32(1.0)) * ref_norm
    ref_disp = jnp.exp(jax.nn.softmax(ld, axis=1))
    assert jnp.allclose(out["normalized"], ref_norm, rtol=2e-3, atol=1e-5)
    assert jnp.allclose(out["scale_x"], ref_scale, rtol=2e-3, atol=1e-5)
    assert jnp.allclose(out["disperation"], ref_disp, rtol=2e-3, atol=1e-5)

    # Loose sanity check against the full-f32 PyTorch-semantics reference.
    f32_norm = jax.nn.softmax(x @ feature, axis=1)
    assert jnp.allclose(out["normalized"], f32_norm, rtol=5e-2, atol=1e-3)

    print("KERNEL_OK")
</pallas_src>

<mosaic_0001>
module attributes {stable_mosaic.version = 11 : i64} {
  func.func @_nb_decoder_kernel(%arg0: i32, %arg1: memref<1x1xf32, #tpu.memory_space<smem>>, %arg2: memref<16x32xbf16, #tpu.memory_space<vmem>>, %arg3: memref<32x512xbf16, #tpu.memory_space<vmem>>, %arg4: memref<16x256xf32, #tpu.memory_space<vmem>>, %arg5: memref<16x256xf32, #tpu.memory_space<vmem>>, %arg6: memref<16x256xf32, #tpu.memory_space<vmem>>) attributes {dimension_semantics = [#tpu.dimension_semantics<parallel>], iteration_bounds = array<i64: 1>, scalar_prefetch = 0 : i64, scratch_operands = 0 : i64, tpu.core_type = #tpu.core_type<tc>, window_params = [{transform_indices = @transform_0, window_bounds = array<i64: 1, 1>}, {transform_indices = @transform_1, window_bounds = array<i64: 16, 32>}, {pipeline_mode = #tpu.pipeline_mode<synchronous>, transform_indices = @transform_2, window_bounds = array<i64: 32, 512>}, {transform_indices = @transform_3, window_bounds = array<i64: 16, 256>}, {transform_indices = @transform_4, window_bounds = array<i64: 16, 256>}, {transform_indices = @transform_5, window_bounds = array<i64: 16, 256>}]} {
    %c0 = arith.constant 0 : index
    %c0_0 = arith.constant 0 : index
    %0 = vector.load %arg2[%c0, %c0_0] : memref<16x32xbf16, #tpu.memory_space<vmem>>, vector<16x32xbf16>
    %c0_1 = arith.constant 0 : index
    %c0_2 = arith.constant 0 : index
    %1 = vector.load %arg3[%c0_1, %c0_2] : memref<32x512xbf16, #tpu.memory_space<vmem>>, vector<32x512xbf16>
    %cst = arith.constant dense<0.000000e+00> : vector<16x512xf32>
    %2 = tpu.matmul %0, %1, %cst {dimension_numbers = #tpu.dot_dimension_numbers<[1], [0], [0], [1], [0, 0, 1, 1], [], []>} : vector<16x32xbf16>, vector<32x512xbf16>, vector<16x512xf32> -> vector<16x512xf32>
    %3 = tpu.iota {dimensions = array<i32: 1>} : vector<16x512xi32>
    %c256_i32 = arith.constant 256 : i32
    %4 = vector.broadcast %c256_i32 : i32 to vector<16x512xi32>
    %5 = arith.cmpi slt, %3, %4 : vector<16x512xi32>
    %c256_i32_3 = arith.constant 256 : i32
    %6 = vector.broadcast %c256_i32_3 : i32 to vector<16x512xi32>
    %7 = arith.subi %3, %6 : vector<16x512xi32>
    %8 = arith.select %5, %3, %7 : vector<16x512xi1>, vector<16x512xi32>
    %c200_i32 = arith.constant 200 : i32
    %9 = vector.broadcast %c200_i32 : i32 to vector<16x512xi32>
    %10 = arith.cmpi sge, %8, %9 : vector<16x512xi32>
    %cst_4 = arith.constant -1.000000e+30 : f32
    %11 = vector.broadcast %cst_4 : f32 to vector<16x512xf32>
    %12 = arith.select %10, %11, %2 : vector<16x512xi1>, vector<16x512xf32>
    %13 = vector.extract_strided_slice %12 {offsets = [0, 0], sizes = [16, 256], strides = [1, 1]} : vector<16x512xf32> to vector<16x256xf32>
    %14 = vector.extract_strided_slice %12 {offsets = [0, 256], sizes = [16, 256], strides = [1, 1]} : vector<16x512xf32> to vector<16x256xf32>
    %cst_5 = arith.constant dense<0xFF800000> : vector<16xf32>
    %15 = vector.multi_reduction <maximumf>, %13, %cst_5 [1] : vector<16x256xf32> to vector<16xf32>
    %16 = vector.shape_cast %15 : vector<16xf32> to vector<16x1xf32>
    %17 = vector.broadcast %16 : vector<16x1xf32> to vector<16x256xf32>
    %18 = arith.subf %13, %17 : vector<16x256xf32>
    %19 = math.exp %18 : vector<16x256xf32>
    %cst_6 = arith.constant dense<0.000000e+00> : vector<16xf32>
    %20 = vector.multi_reduction <add>, %19, %cst_6 [1] : vector<16x256xf32> to vector<16xf32>
    %21 = vector.shape_cast %20 : vector<16xf32> to vector<16x1xf32>
    %22 = tpu.reciprocal %21 {approx = true} : vector<16x1xf32> -> vector<16x1xf32>
    %23 = vector.broadcast %22 : vector<16x1xf32> to vector<16x256xf32>
    %24 = arith.mulf %19, %23 : vector<16x256xf32>
    %c0_7 = arith.constant 0 : index
    %c0_8 = arith.constant 0 : index
    %25 = vector.load %arg4[%c0_7, %c0_8] : memref<16x256xf32, #tpu.memory_space<vmem>>, vector<16x256xf32>
    tpu.vector_store %arg4[%c0_7, %c0_8], %24 {strides = array<i32>} : memref<16x256xf32, #tpu.memory_space<vmem>>, vector<16x256xf32>,
    %c0_9 = arith.constant 0 : index
    %c0_10 = arith.constant 0 : index
    %26 = memref.load %arg1[%c0_9, %c0_10] : memref<1x1xf32, #tpu.memory_space<smem>>
    %27 = vector.broadcast %26 : f32 to vector<16x256xf32>
    %28 = arith.mulf %27, %24 : vector<16x256xf32>
    %c0_11 = arith.constant 0 : index
    %c0_12 = arith.constant 0 : index
    %29 = vector.load %arg6[%c0_11, %c0_12] : memref<16x256xf32, #tpu.memory_space<vmem>>, vector<16x256xf32>
    tpu.vector_store %arg6[%c0_11, %c0_12], %28 {strides = array<i32>} : memref<16x256xf32, #tpu.memory_space<vmem>>, vector<16x256xf32>,
    %cst_13 = arith.constant dense<0xFF800000> : vector<16xf32>
    %30 = vector.multi_reduction <maximumf>, %14, %cst_13 [1] : vector<16x256xf32> to vector<16xf32>
    %31 = vector.shape_cast %30 : vector<16xf32> to vector<16x1xf32>
    %32 = vector.broadcast %31 : vector<16x1xf32> to vector<16x256xf32>
    %33 = arith.subf %14, %32 : vector<16x256xf32>
    %34 = math.exp %33 : vector<16x256xf32>
    %cst_14 = arith.constant dense<0.000000e+00> : vector<16xf32>
    %35 = vector.multi_reduction <add>, %34, %cst_14 [1] : vector<16x256xf32> to vector<16xf32>
    %36 = vector.shape_cast %35 : vector<16xf32> to vector<16x1xf32>
    %37 = tpu.reciprocal %36 {approx = true} : vector<16x1xf32> -> vector<16x1xf32>
    %38 = vector.broadcast %37 : vector<16x1xf32> to vector<16x256xf32>
    %39 = arith.mulf %34, %38 : vector<16x256xf32>
    %40 = math.exp %39 : vector<16x256xf32>
    %c0_15 = arith.constant 0 : index
    %c0_16 = arith.constant 0 : index
    %41 = vector.load %arg5[%c0_15, %c0_16] : memref<16x256xf32, #tpu.memory_space<vmem>>, vector<16x256xf32>
    tpu.vector_store %arg5[%c0_15, %c0_16], %40 {strides = array<i32>} : memref<16x256xf32, #tpu.memory_space<vmem>>, vector<16x256xf32>,
    return
  }
  func.func @transform_0(%arg0: i32) -> (i32, i32) {
    %c0_i32 = arith.constant 0 : i32
    %c0_i32_0 = arith.constant 0 : i32
    %c0_i32_1 = arith.constant 0 : i32
    return %c0_i32, %c0_i32_0 : i32, i32
  }
  func.func @transform_1(%arg0: i32) -> (i32, i32) {
    %c0_i32 = arith.constant 0 : i32
    %c0_i32_0 = arith.constant 0 : i32
    return %arg0, %c0_i32 : i32, i32
  }
  func.func @transform_2(%arg0: i32) -> (i32, i32) {
    %c0_i32 = arith.constant 0 : i32
    %c0_i32_0 = arith.constant 0 : i32
    %c0_i32_1 = arith.constant 0 : i32
    return %c0_i32, %c0_i32_0 : i32, i32
  }
  func.func @transform_3(%arg0: i32) -> (i32, i32) {
    %c0_i32 = arith.constant 0 : i32
    %c0_i32_0 = arith.constant 0 : i32
    return %arg0, %c0_i32 : i32, i32
  }
  func.func @transform_4(%arg0: i32) -> (i32, i32) {
    %c0_i32 = arith.constant 0 : i32
    %c0_i32_0 = arith.constant 0 : i32
    return %arg0, %c0_i32 : i32, i32
  }
  func.func @transform_5(%arg0: i32) -> (i32, i32) {
    %c0_i32 = arith.constant 0 : i32
    %c0_i32_0 = arith.constant 0 : i32
    return %arg0, %c0_i32 : i32, i32
  }
}

module attributes {stable_mosaic.version = 11 : i64} {
  func.func @_nb_decoder_kernel(%arg0: i32, %arg1: memref<1x1xf32, #tpu.memory_space<smem>>, %arg2: memref<16x32xbf16, #tpu.memory_space<vmem>>, %arg3: memref<32x512xbf16, #tpu.memory_space<vmem>>, %arg4: memref<16x256xf32, #tpu.memory_space<vmem>>, %arg5: memref<16x256xf32, #tpu.memory_space<vmem>>, %arg6: memref<16x256xf32, #tpu.memory_space<vmem>>) attributes {dimension_semantics = [#tpu.dimension_semantics<parallel>], iteration_bounds = array<i64: 1>, scalar_prefetch = 0 : i64, scratch_operands = 0 : i64, tpu.core_type = #tpu.core_type<tc>, window_params = [{transform_indices = @transform_0, window_bounds = array<i64: 1, 1>}, {transform_indices = @transform_1, window_bounds = array<i64: 16, 32>}, {pipeline_mode = #tpu.pipeline_mode<synchronous>, transform_indices = @transform_2, window_bounds = array<i64: 32, 512>}, {transform_indices = @transform_3, window_bounds = array<i64: 16, 256>}, {transform_indices = @transform_4, window_bounds = array<i64: 16, 256>}, {transform_indices = @transform_5, window_bounds = array<i64: 16, 256>}]} {
    %c0 = arith.constant 0 : index
    %c0_0 = arith.constant 0 : index
    %0 = vector.load %arg2[%c0, %c0_0] : memref<16x32xbf16, #tpu.memory_space<vmem>>, vector<16x32xbf16>
    %c0_1 = arith.constant 0 : index
    %c0_2 = arith.constant 0 : index
    %1 = vector.load %arg3[%c0_1, %c0_2] : memref<32x512xbf16, #tpu.memory_space<vmem>>, vector<32x512xbf16>
    %cst = arith.constant dense<0.000000e+00> : vector<16x512xf32>
    %2 = tpu.matmul %0, %1, %cst {dimension_numbers = #tpu.dot_dimension_numbers<[1], [0], [0], [1], [0, 0, 1, 1], [], []>} : vector<16x32xbf16>, vector<32x512xbf16>, vector<16x512xf32> -> vector<16x512xf32>
    %3 = tpu.iota {dimensions = array<i32: 1>} : vector<16x512xi32>
    %c256_i32 = arith.constant 256 : i32
    %4 = vector.broadcast %c256_i32 : i32 to vector<16x512xi32>
    %5 = arith.cmpi slt, %3, %4 : vector<16x512xi32>
    %c256_i32_3 = arith.constant 256 : i32
    %6 = vector.broadcast %c256_i32_3 : i32 to vector<16x512xi32>
    %7 = arith.subi %3, %6 : vector<16x512xi32>
    %8 = arith.select %5, %3, %7 : vector<16x512xi1>, vector<16x512xi32>
    %c200_i32 = arith.constant 200 : i32
    %9 = vector.broadcast %c200_i32 : i32 to vector<16x512xi32>
    %10 = arith.cmpi sge, %8, %9 : vector<16x512xi32>
    %cst_4 = arith.constant -1.000000e+30 : f32
    %11 = vector.broadcast %cst_4 : f32 to vector<16x512xf32>
    %12 = arith.select %10, %11, %2 : vector<16x512xi1>, vector<16x512xf32>
    %13 = vector.extract_strided_slice %12 {offsets = [0, 0], sizes = [16, 256], strides = [1, 1]} : vector<16x512xf32> to vector<16x256xf32>
    %14 = vector.extract_strided_slice %12 {offsets = [0, 256], sizes = [16, 256], strides = [1, 1]} : vector<16x512xf32> to vector<16x256xf32>
    %cst_5 = arith.constant dense<0xFF800000> : vector<16xf32>
    %15 = vector.multi_reduction <maximumf>, %13, %cst_5 [1] : vector<16x256xf32> to vector<16xf32>
    %16 = vector.shape_cast %15 : vector<16xf32> to vector<16x1xf32>
    %17 = vector.broadcast %16 : vector<16x1xf32> to vector<16x256xf32>
    %18 = arith.subf %13, %17 : vector<16x256xf32>
    %19 = math.exp %18 : vector<16x256xf32>
    %cst_6 = arith.constant dense<0.000000e+00> : vector<16xf32>
    %20 = vector.multi_reduction <add>, %19, %cst_6 [1] : vector<16x256xf32> to vector<16xf32>
    %21 = vector.shape_cast %20 : vector<16xf32> to vector<16x1xf32>
    %22 = tpu.reciprocal %21 {approx = true} : vector<16x1xf32> -> vector<16x1xf32>
    %23 = vector.broadcast %22 : vector<16x1xf32> to vector<16x256xf32>
    %24 = arith.mulf %19, %23 : vector<16x256xf32>
    %c0_7 = arith.constant 0 : index
    %c0_8 = arith.constant 0 : index
    %25 = vector.load %arg4[%c0_7, %c0_8] : memref<16x256xf32, #tpu.memory_space<vmem>>, vector<16x256xf32>
    tpu.vector_store %arg4[%c0_7, %c0_8], %24 {strides = array<i32>} : memref<16x256xf32, #tpu.memory_space<vmem>>, vector<16x256xf32>,
    %c0_9 = arith.constant 0 : index
    %c0_10 = arith.constant 0 : index
    %26 = memref.load %arg1[%c0_9, %c0_10] : memref<1x1xf32, #tpu.memory_space<smem>>
    %27 = vector.broadcast %26 : f32 to vector<16x256xf32>
    %28 = arith.mulf %27, %24 : vector<16x256xf32>
    %c0_11 = arith.constant 0 : index
    %c0_12 = arith.constant 0 : index
    %29 = vector.load %arg6[%c0_11, %c0_12] : memref<16x256xf32, #tpu.memory_space<vmem>>, vector<16x256xf32>
    tpu.vector_store %arg6[%c0_11, %c0_12], %28 {strides = array<i32>} : memref<16x256xf32, #tpu.memory_space<vmem>>, vector<16x256xf32>,
    %cst_13 = arith.constant dense<0xFF800000> : vector<16xf32>
    %30 = vector.multi_reduction <maximumf>, %14, %cst_13 [1] : vector<16x256xf32> to vector<16xf32>
    %31 = vector.shape_cast %30 : vector<16xf32> to vector<16x1xf32>
    %32 = vector.broadcast %31 : vector<16x1xf32> to vector<16x256xf32>
    %33 = arith.subf %14, %32 : vector<16x256xf32>
    %34 = math.exp %33 : vector<16x256xf32>
    %cst_14 = arith.constant dense<0.000000e+00> : vector<16xf32>
    %35 = vector.multi_reduction <add>, %34, %cst_14 [1] : vector<16x256xf32> to vector<16xf32>
    %36 = vector.shape_cast %35 : vector<16xf32> to vector<16x1xf32>
    %37 = tpu.reciprocal %36 {approx = true} : vector<16x1xf32> -> vector<16x1xf32>
    %38 = vector.broadcast %37 : vector<16x1xf32> to vector<16x256xf32>
    %39 = arith.mulf %34, %38 : vector<16x256xf32>
    %40 = math.exp %39 : vector<16x256xf32>
    %c0_15 = arith.constant 0 : index
    %c0_16 = arith.constant 0 : index
    %41 = vector.load %arg5[%c0_15, %c0_16] : memref<16x256xf32, #tpu.memory_space<vmem>>, vector<16x256xf32>
    tpu.vector_store %arg5[%c0_15, %c0_16], %40 {strides = array<i32>} : memref<16x256xf32, #tpu.memory_space<vmem>>, vector<16x256xf32>,
    return
  }
  func.func @transform_0(%arg0: i32) -> (i32, i32) {
    %c0_i32 = arith.constant 0 : i32
    %c0_i32_0 = arith.constant 0 : i32
    %c0_i32_1 = arith.constant 0 : i32
    return %c0_i32, %c0_i32_0 : i32, i32
  }
  func.func @transform_1(%arg0: i32) -> (i32, i32) {
    %c0_i32 = arith.constant 0 : i32
    %c0_i32_0 = arith.constant 0 : i32
    return %arg0, %c0_i32 : i32, i32
  }
  func.func @transform_2(%arg0: i32) -> (i32, i32) {
    %c0_i32 = arith.constant 0 : i32
    %c0_i32_0 = arith.constant 0 : i32
    %c0_i32_1 = arith.constant 0 : i32
    return %c0_i32, %c0_i32_0 : i32, i32
  }
  func.func @transform_3(%arg0: i32) -> (i32, i32) {
    %c0_i32 = arith.constant 0 : i32
    %c0_i32_0 = arith.constant 0 : i32
    return %arg0, %c0_i32 : i32, i32
  }
  func.func @transform_4(%arg0: i32) -> (i32, i32) {
    %c0_i32 = arith.constant 0 : i32
    %c0_i32_0 = arith.constant 0 : i32
    return %arg0, %c0_i32 : i32, i32
  }
  func.func @transform_5(%arg0: i32) -> (i32, i32) {
    %c0_i32 = arith.constant 0 : i32
    %c0_i32_0 = arith.constant 0 : i32
    return %arg0, %c0_i32 : i32, i32
  }
}

</mosaic_0001>

<bundles_post_ra>
// kernel: tpu_custom_call.1
= control target key start
LH: loop header
LB: loop body
LE: loop exit
PB: predicated region body
PF: predicated region fallthrough
CT: control target
= control target key end

     0   :  { %12 = vsyncpa [#allocation4], 0  ;;  %s666_s0 = inlined_call_operand.<no memory space> [shape: f32[1,1], index: 0, kind: input, shape index: {}]   ;;  %s667_s1 = inlined_call_operand.hbm [shape: bf16[16,32], index: 1, kind: input, shape index: {}]   ;;  %s668_s2 = inlined_call_operand.hbm [shape: bf16[32,512], index: 2, kind: input, shape index: {}]   ;;  %s669_s3 = inlined_call_operand.hbm [shape: f32[16,256], index: 3, kind: output, shape index: {0}]   ;;  %s670_s4 = inlined_call_operand.hbm [shape: f32[16,256], index: 4, kind: output, shape index: {1}]   ;;  %s671_s5 = inlined_call_operand.hbm [shape: f32[16,256], index: 5, kind: output, shape index: {2}]  }
   0x1   :  { %13 = vsyncpa [#allocation7], 0 }
   0x2   :  { %14 = vsyncpa [#allocation5], 0 }
   0x3   :  { %15 = vsyncpa [#allocation10], 0  ;;  %s544_s18 = smov [#allocation3]   ;;  %s426_s22 = scalar_lea.hbm %s667_s1, 128 }
   0x4   :  { %s23_s19 = sshll.u32 %s544_s18, 4  ;;  %p427_p0 = scmp.ne.s32.totalorder %s667_s1, %s426_s22  ;;  %s24_s19 = int_to_ptr.vmem [resolvable:$true] %s23_s19 }
   0x5   :  { %p430_p1 = scmp.lt.u32.totalorder %s426_s22, %s667_s1 }
   0x7   :  { %p432_p2 = pnand %p430_p1, %p427_p0 }
   0x9   :  { %435 = shalt.err (!%p432_p2)
}
   0xa   :  { %s436_s27 = scalar_lea.vmem %s24_s19, 128  ;;  %p441_p4 = scmp.lt.s32.totalorder %s24_s19, %s24_s19 }
   0xb   :  { %p437_p3 = scmp.ne.s32.totalorder %s24_s19, %s436_s27  ;;  %p442_p5 = scmp.lt.s32.totalorder %s436_s27, %s436_s27 }
   0xd   :  { %p443_p6 = por %p442_p5, %p441_p4 }
   0xf   :  { %p444_p7 = pnand %p443_p6, %p437_p3 }
  0x11   :  { %447 = shalt.err (!%p444_p7)
}
  0x12   :  { %s545_s28 = smov 64   ;;  %s546_s29 = smov 4  }
  0x13   :  { %29 = dma.hbm_to_vmem [thread:$0]  %s667_s1, 128, %s24_s19, [#allocation4], %s545_s28, %s545_s28, %s546_s29  }
  0x14   :  { %s547_s7 = smov [#allocation6]   ;;  %s448_s11 = scalar_lea.hbm %s668_s2, 1024 }
  0x15   :  { %s35_s8 = sshll.u32 %s547_s7, 4  ;;  %p449_p8 = scmp.ne.s32.totalorder %s668_s2, %s448_s11  ;;  %s36_s8 = int_to_ptr.vmem [resolvable:$true] %s35_s8 }
  0x16   :  { %p452_p9 = scmp.lt.u32.totalorder %s448_s11, %s668_s2 }
  0x18   :  { %p454_p10 = pnand %p452_p9, %p449_p8 }
  0x1a   :  { %457 = shalt.err (!%p454_p10)
}
  0x1b   :  { %s458_s16 = scalar_lea.vmem %s36_s8, 1024  ;;  %p463_p12 = scmp.lt.s32.totalorder %s36_s8, %s36_s8 }
  0x1c   :  { %p459_p11 = scmp.ne.s32.totalorder %s36_s8, %s458_s16  ;;  %p464_p13 = scmp.lt.s32.totalorder %s458_s16, %s458_s16 }
  0x1e   :  { %p465_p0 = por %p464_p13, %p463_p12 }
  0x20   :  { %p466_p1 = pnand %p465_p0, %p459_p11 }
  0x22   :  { %469 = shalt.err (!%p466_p1)
}
  0x23   :  { %s548_s1 = smov 256   ;;  %s549_s17 = smov 16  }
  0x24   :  { %41 = dma.hbm_to_vmem [thread:$0]  %s668_s2, 1024, %s36_s8, [#allocation7], %s548_s1, %s548_s1, %s549_s17  }
  0x25   :  { %536 = dma.done.wait [#allocation4], 128  }
  0x26   :  { %537 = vsyncadd [#allocation4], 4294967168 }
  0x27   :  { %538 = dma.done.wait [#allocation7], 1024  }
  0x28   :  { %539 = vsyncadd [#allocation7], 4294966272  ;;  %v550_v0 = vmov 0   ;;  %v381_v1 = vld [vmem:[#allocation6 + $0x4] ss:$16 sps:$4 sm:$0xff]   ;;  %v393_v9 = vld [vmem:[#allocation3] sm:$0xff]   ;;  %v194_v10 = vlaneseq }
  0x29   :  { %140 = vmatprep.mubr.bf16.mxu0 %v550_v0  ;;  %183 = vmatprep.mubr.bf16.mxu1 %v550_v0  ;;  %v383_v2 = vld [vmem:[#allocation6 + $0xc] ss:$16 sps:$4 sm:$0xff]   ;;  %v385_v3 = vld [vmem:[#allocation6] ss:$16 sps:$4 sm:$0xff]   ;;  %v386_v4 = vld [vmem:[#allocation6 + $0x8] ss:$16 sps:$4 sm:$0xff]  }
  0x2a   :  { %108 = vmatprep.subr.bf16.mxu0 %v381_v1  ;;  %151 = vmatprep.subr.bf16.mxu1 %v383_v2  ;;  %v387_v5 = vld [vmem:[#allocation6 + $0x24] ss:$16 sps:$4 sm:$0xff]   ;;  %v389_v6 = vld [vmem:[#allocation6 + $0x2c] ss:$16 sps:$4 sm:$0xff]   ;;  %v391_v7 = vld [vmem:[#allocation6 + $0x20] ss:$16 sps:$4 sm:$0xff]  }
  0x2b   :  { %109 = vmatpush1.bf16.msra.mxu0 %v385_v3  ;;  %152 = vmatpush1.bf16.msra.mxu1 %v386_v4  ;;  %v392_v8 = vld [vmem:[#allocation6 + $0x28] ss:$16 sps:$4 sm:$0xff]   ;;  %vm104_vm0 = vcmask 261120   ;;  %v195_v11 = vand.u32 127, %v194_v10  ;;  %s551_s21 = smov [#allocation8]  }
  0x2c   :  { %110 = vmatprep.subr.bf16.mxu0 %v387_v5  ;;  %153 = vmatprep.subr.bf16.mxu1 %v389_v6  ;;  %s313_s22 = sshll.u32 %s551_s21, 4  ;;  %s314_s22 = int_to_ptr.vmem [resolvable:$true] %s313_s22 }
  0x2d   :  { %v198_v12 = vadd.s32 384, %v195_v11  ;;  %v196_v13 = vadd.s32 128, %v195_v11  ;;  %p475_p3 = scmp.lt.s32.totalorder %s314_s22, %s314_s22 }
  0x2f   :  { %111 = vmatpush1.bf16.msra.mxu0 %v391_v7  ;;  %154 = vmatpush1.bf16.msra.mxu1 %v392_v8  ;;  %v370_v14 = vadd.s32 4294967040, %v198_v12  ;;  %vm211_vm1 = vcmp.ge.s32.totalorder %v196_v13, 200 }
  0x31   :  { %vm213_vm2 = vcmp.ge.s32.totalorder %v370_v14, 200 }
  0x32   :  { %366 = vmatmul.mubr.msk.bf16.vlgmr.msra.gmra.mrb[0].mxu0 %vm104_vm0, %v393_v9  ;;  %367 = vmatmul.mubr.msk.bf16.vlgmr.msra.gmra.mrb[0].mxu1 %vm104_vm0, %v393_v9  ;;  %v257_v9 = vstv %s666_s0  ;;  %s470_s0 = scalar_lea.vmem %s314_s22, 512 }
  0x33   :  { %p471_p2 = scmp.ne.s32.totalorder %s314_s22, %s470_s0  ;;  %p476_p4 = scmp.lt.s32.totalorder %s470_s0, %s470_s0 }
  0x35   :  { %p477_p5 = por %p476_p4, %p475_p3 }
  0x37   :  { %p478_p6 = pnand %p477_p5, %p471_p2 }
 0x105   :  { %v142_v15 = vpop.f32.mrb[0].mxu0  ;;  %v185_v16 = vpop.f32.mrb[0].mxu1 }
 0x106   :  { %v144_v17 = vpop.f32.mrb[1].mxu0  ;;  %v187_v18 = vpop.f32.mrb[1].mxu1 }
 0x107   :  { %v215_v19 = vsel %vm211_vm1, -1e+30, %v144_v17  ;;  %v217_v20 = vsel %vm213_vm2, -1e+30, %v187_v18  ;;  %v189_v21 = vpop.f32.mrb[2].mxu1  ;;  %v146_v22 = vpop.f32.mrb[2].mxu0 }
 0x108   :  { %v191_v23 = vpop.f32.mrb[3].mxu1  ;;  %v266_v24 = vmax.f32 %v185_v16, %v217_v20  ;;  %v222_v25 = vmax.f32 %v142_v15, %v215_v19  ;;  %v148_v26 = vpop.f32.mrb[3].mxu0 }
 0x109   :  { %v221_v27 = vsel %vm213_vm2, -1e+30, %v191_v23  ;;  %v219_v28 = vsel %vm211_vm1, -1e+30, %v148_v26 }
 0x10a   :  { %267 = vmax.xlane.f32.xlu0 %v266_v24  ;;  %223 = vmax.xlane.f32.xlu1 %v222_v25  ;;  %v225_v29 = vmax.f32 %v146_v22, %v219_v28  ;;  %v269_v30 = vmax.f32 %v189_v21, %v221_v27 }
 0x10e   :  { %270 = vmax.xlane.f32.xlu0 %v269_v30  ;;  %226 = vmax.xlane.f32.xlu1 %v225_v29 }
 0x197   :  { %v268_v31 = vpop.xlane.xlu0 %267  ;;  %v224_v32 = vpop.xlane.xlu1 %223 }
 0x198   :  { %v272_v33 = vsub.f32 %v185_v16, %v268_v31  ;;  %v273_v34 = vsub.f32 %v217_v20, %v268_v31  ;;  %v228_v35 = vsub.f32 %v142_v15, %v224_v32  ;;  %v229_v36 = vsub.f32 %v215_v19, %v224_v32 }
 0x19a   :  { %v276_v37 = vmul.f32 1.442695, %v272_v33  ;;  %v278_v38 = vmul.f32 1.442695, %v273_v34  ;;  %v232_v39 = vmul.f32 1.442695, %v228_v35 }
 0x19b   :  { %v234_v40 = vmul.f32 1.442695, %v229_v36  ;;  %v271_v41 = vpop.xlane.xlu0 %270  ;;  %v227_v42 = vpop.xlane.xlu1 %226 }
 0x19c   :  { %394 = vpow2.f32 %v276_v37  ;;  %v274_v43 = vsub.f32 %v189_v21, %v271_v41  ;;  %v275_v44 = vsub.f32 %v221_v27, %v271_v41  ;;  %v230_v45 = vsub.f32 %v146_v22, %v227_v42 }
 0x19d   :  { %396 = vpow2.f32 %v278_v38  ;;  %v231_v46 = vsub.f32 %v219_v28, %v227_v42 }
 0x19e   :  { %398 = vpow2.f32 %v232_v39  ;;  %v280_v47 = vmul.f32 1.442695, %v274_v43  ;;  %v282_v48 = vmul.f32 1.442695, %v275_v44  ;;  %v236_v49 = vmul.f32 1.442695, %v230_v45 }
 0x19f   :  { %400 = vpow2.f32 %v234_v40  ;;  %v238_v50 = vmul.f32 1.442695, %v231_v46 }
 0x1a0   :  { %402 = vpow2.f32 %v280_v47 }
 0x1a1   :  { %404 = vpow2.f32 %v282_v48 }
 0x1a2   :  { %406 = vpow2.f32 %v236_v49 }
 0x1a3   :  { %408 = vpow2.f32 %v238_v50 }
 0x1a6   :  { %v395_v51 = vpop.eup %394 }
 0x1a7   :  { %v397_v52 = vpop.eup %396 }
 0x1a8   :  { %v399_v53 = vpop.eup %398  ;;  %v284_v54 = vadd.f32 %v397_v52, %v395_v51 }
 0x1a9   :  { %v401_v55 = vpop.eup %400 }
 0x1aa   :  { %v403_v56 = vpop.eup %402  ;;  %285 = vadd.xlane.f32.xlu0 %v284_v54  ;;  %v240_v59 = vadd.f32 %v401_v55, %v399_v53 }
 0x1ab   :  { %v405_v57 = vpop.eup %404 }
 0x1ac   :  { %v407_v58 = vpop.eup %406  ;;  %v287_v60 = vadd.f32 %v405_v57, %v403_v56 }
 0x1ad   :  { %v409_v61 = vpop.eup %408 }
 0x1ae   :  { %241 = vadd.xlane.f32.xlu0 %v240_v59  ;;  %288 = vadd.xlane.f32.xlu1 %v287_v60  ;;  %v243_v62 = vadd.f32 %v409_v61, %v407_v58 }
 0x1b2   :  { %244 = vadd.xlane.f32.xlu1 %v243_v62 }
 0x237   :  { %v286_v63 = vpop.xlane.xlu0 %285 }
 0x238   :  { %410 = vrcp.f32 %v286_v63 }
 0x23b   :  { %v242_v0 = vpop.xlane.xlu0 %241  ;;  %v289_v1 = vpop.xlane.xlu1 %288 }
 0x23c   :  { %412 = vrcp.f32 %v242_v0 }
 0x23d   :  { %414 = vrcp.f32 %v289_v1 }
 0x23f   :  { %v245_v2 = vpop.xlane.xlu1 %244 }
 0x240   :  { %416 = vrcp.f32 %v245_v2 }
 0x242   :  { %v411_v3 = vpop.eup %410 }
 0x243   :  { %v292_v4 = vmul.f32 %v411_v3, %v395_v51  ;;  %v293_v5 = vmul.f32 %v411_v3, %v397_v52 }
 0x245   :  { %v296_v6 = vmul.f32 1.442695, %v292_v4  ;;  %v298_v7 = vmul.f32 1.442695, %v293_v5 }
 0x246   :  { %v413_v8 = vpop.eup %412 }
 0x247   :  { %v415_v10 = vpop.eup %414  ;;  %418 = vpow2.f32 %v296_v6  ;;  %v248_v11 = vmul.f32 %v413_v8, %v399_v53  ;;  %v249_v12 = vmul.f32 %v413_v8, %v401_v55 }
 0x248   :  { %420 = vpow2.f32 %v298_v7  ;;  %v294_v13 = vmul.f32 %v415_v10, %v403_v56  ;;  %v295_v14 = vmul.f32 %v415_v10, %v405_v57 }
 0x249   :  { %252 = vst [vmem:[#allocation8] sm:$0xff] %v248_v11  ;;  %253 = vst [vmem:[#allocation8 + $0x8] sm:$0xff] %v249_v12  ;;  %v258_v15 = vmul.f32 %v257_v9, %v248_v11  ;;  %v259_v16 = vmul.f32 %v257_v9, %v249_v12 }
 0x24a   :  { %v417_v17 = vpop.eup %416  ;;  %v300_v18 = vmul.f32 1.442695, %v294_v13  ;;  %v302_v19 = vmul.f32 1.442695, %v295_v14 }
 0x24b   :  { %v250_v20 = vmul.f32 %v417_v17, %v407_v58  ;;  %v251_v21 = vmul.f32 %v417_v17, %v409_v61  ;;  %262 = vst [vmem:[#allocation11] sm:$0xff] %v258_v15  ;;  %263 = vst [vmem:[#allocation11 + $0x8] sm:$0xff] %v259_v16 }
 0x24c   :  { %422 = vpow2.f32 %v300_v18 }
 0x24d   :  { %424 = vpow2.f32 %v302_v19  ;;  %254 = vst [vmem:[#allocation8 + $0x10] sm:$0xff] %v250_v20  ;;  %255 = vst [vmem:[#allocation8 + $0x18] sm:$0xff] %v251_v21  ;;  %v260_v22 = vmul.f32 %v257_v9, %v250_v20  ;;  %v261_v23 = vmul.f32 %v257_v9, %v251_v21 }
 0x24e   :  { %481 = shalt.err (!%p478_p6)
}
 0x24f   :  { %s482_s25 = scalar_lea.hbm %s669_s3, 512 }
 0x250   :  { %p483_p7 = scmp.ne.s32.totalorder %s669_s3, %s482_s25  ;;  %p486_p8 = scmp.lt.u32.totalorder %s482_s25, %s669_s3 }
 0x252   :  { %p488_p9 = pnand %p486_p8, %p483_p7 }
 0x254   :  { %491 = shalt.err (!%p488_p9)
}
 0x255   :  { %319 = dma.vmem_to_hbm [thread:$0]  %s314_s22, 512, %s669_s3, [#allocation5], %s548_s1, %s548_s1, %s549_s17   ;;  %264 = vst [vmem:[#allocation11 + $0x10] sm:$0xff] %v260_v22  ;;  %265 = vst [vmem:[#allocation11 + $0x18] sm:$0xff] %v261_v23  ;;  %v419_v24 = vpop.eup %418 }
 0x256   :  { %v421_v25 = vpop.eup %420  ;;  %304 = vst [vmem:[#allocation9] sm:$0xff] %v419_v24  ;;  %s552_s7 = smov [#allocation9]   ;;  %s553_s9 = smov [#allocation11]  }
 0x257   :  { %305 = vst [vmem:[#allocation9 + $0x8] sm:$0xff] %v421_v25  ;;  %s325_s8 = sshll.u32 %s552_s7, 4  ;;  %s337_s10 = sshll.u32 %s553_s9, 4  ;;  %v423_v26 = vpop.eup %422  ;;  %s326_s8 = int_to_ptr.vmem [resolvable:$true] %s325_s8  ;;  %s629_s10 = int_to_ptr.vmem [resolvable:$true] %s337_s10 }
 0x258   :  { %v425_v27 = vpop.eup %424  ;;  %306 = vst [vmem:[#allocation9 + $0x10] sm:$0xff] %v423_v26  ;;  %s492_s11 = scalar_lea.vmem %s326_s8, 512  ;;  %p497_p11 = scmp.lt.s32.totalorder %s326_s8, %s326_s8 }
 0x259   :  { %307 = vst [vmem:[#allocation9 + $0x18] sm:$0xff] %v425_v27  ;;  %p493_p10 = scmp.ne.s32.totalorder %s326_s8, %s492_s11  ;;  %p498_p12 = scmp.lt.s32.totalorder %s492_s11, %s492_s11 }
 0x25b   :  { %p499_p13 = por %p498_p12, %p497_p11 }
 0x25d   :  { %p500_p0 = pnand %p499_p13, %p493_p10 }
 0x25f   :  { %503 = shalt.err (!%p500_p0)
}
 0x260   :  { %s504_s13 = scalar_lea.hbm %s670_s4, 512 }
 0x261   :  { %p505_p1 = scmp.ne.s32.totalorder %s670_s4, %s504_s13  ;;  %p508_p2 = scmp.lt.u32.totalorder %s504_s13, %s670_s4 }
 0x263   :  { %p510_p3 = pnand %p508_p2, %p505_p1 }
 0x265   :  { %513 = shalt.err (!%p510_p3)
}
 0x266   :  { %331 = dma.vmem_to_hbm [thread:$0]  %s326_s8, 512, %s670_s4, [#allocation10], %s548_s1, %s548_s1, %s549_s17  }
 0x267   :  { %s514_s20 = scalar_lea.vmem %s629_s10, 512  ;;  %p519_p5 = scmp.lt.s32.totalorder %s629_s10, %s629_s10 }
 0x268   :  { %p515_p4 = scmp.ne.s32.totalorder %s629_s10, %s514_s20  ;;  %p520_p6 = scmp.lt.s32.totalorder %s514_s20, %s514_s20 }
 0x26a   :  { %p521_p7 = por %p520_p6, %p519_p5 }
 0x26c   :  { %p522_p8 = pnand %p521_p7, %p515_p4 }
 0x26e   :  { %525 = shalt.err (!%p522_p8)
}
 0x26f   :  { %s526_s0 = scalar_lea.hbm %s671_s5, 512 }
 0x270   :  { %p527_p9 = scmp.ne.s32.totalorder %s671_s5, %s526_s0  ;;  %p530_p10 = scmp.lt.u32.totalorder %s526_s0, %s671_s5 }
 0x272   :  { %p532_p11 = pnand %p530_p10, %p527_p9 }
 0x274   :  { %535 = shalt.err (!%p532_p11)
}
 0x275   :  { %343 = dma.vmem_to_hbm [thread:$0]  %s629_s10, 512, %s671_s5, [#allocation10], %s548_s1, %s548_s1, %s549_s17  }
 0x276   :  { %540 = dma.done.wait [#allocation5], 512  }
 0x277   :  { %541 = vsyncadd [#allocation5], 4294966784 }
 0x278   :  { %542 = dma.done.wait [#allocation10], 1024  }
 0x279   :  { %543 = vsyncadd [#allocation10], 4294966272 }
 0x27a   :  { %353 = vsyncpa [#allocation4], 1 }
 0x27b   :  { %354 = vsyncpa [#allocation7], 1 }
 0x27c   :  { %355 = vsyncpa [#allocation5], 1 }
 0x27d   :  { %356 = vsyncpa [#allocation10], 1 }

// kernel: tpu_custom_call.1
= control target key start
LH: loop header
LB: loop body
LE: loop exit
PB: predicated region body
PF: predicated region fallthrough
CT: control target
= control target key end

     0   :  { %12 = vsyncpa [#allocation4], 0  ;;  %s666_s0 = inlined_call_operand.<no memory space> [shape: f32[1,1], index: 0, kind: input, shape index: {}]   ;;  %s667_s1 = inlined_call_operand.hbm [shape: bf16[16,32], index: 1, kind: input, shape index: {}]   ;;  %s668_s2 = inlined_call_operand.hbm [shape: bf16[32,512], index: 2, kind: input, shape index: {}]   ;;  %s669_s3 = inlined_call_operand.hbm [shape: f32[16,256], index: 3, kind: output, shape index: {0}]   ;;  %s670_s4 = inlined_call_operand.hbm [shape: f32[16,256], index: 4, kind: output, shape index: {1}]   ;;  %s671_s5 = inlined_call_operand.hbm [shape: f32[16,256], index: 5, kind: output, shape index: {2}]  }
   0x1   :  { %13 = vsyncpa [#allocation7], 0 }
   0x2   :  { %14 = vsyncpa [#allocation5], 0 }
   0x3   :  { %15 = vsyncpa [#allocation10], 0  ;;  %s544_s18 = smov [#allocation3]   ;;  %s426_s22 = scalar_lea.hbm %s667_s1, 128 }
   0x4   :  { %s23_s19 = sshll.u32 %s544_s18, 4  ;;  %p427_p0 = scmp.ne.s32.totalorder %s667_s1, %s426_s22  ;;  %s24_s19 = int_to_ptr.vmem [resolvable:$true] %s23_s19 }
   0x5   :  { %p430_p1 = scmp.lt.u32.totalorder %s426_s22, %s667_s1 }
   0x7   :  { %p432_p2 = pnand %p430_p1, %p427_p0 }
   0x9   :  { %435 = shalt.err (!%p432_p2)
}
   0xa   :  { %s436_s27 = scalar_lea.vmem %s24_s19, 128  ;;  %p441_p4 = scmp.lt.s32.totalorder %s24_s19, %s24_s19 }
   0xb   :  { %p437_p3 = scmp.ne.s32.totalorder %s24_s19, %s436_s27  ;;  %p442_p5 = scmp.lt.s32.totalorder %s436_s27, %s436_s27 }
   0xd   :  { %p443_p6 = por %p442_p5, %p441_p4 }
   0xf   :  { %p444_p7 = pnand %p443_p6, %p437_p3 }
  0x11   :  { %447 = shalt.err (!%p444_p7)
}
  0x12   :  { %s545_s28 = smov 64   ;;  %s546_s29 = smov 4  }
  0x13   :  { %29 = dma.hbm_to_vmem [thread:$0]  %s667_s1, 128, %s24_s19, [#allocation4], %s545_s28, %s545_s28, %s546_s29  }
  0x14   :  { %s547_s7 = smov [#allocation6]   ;;  %s448_s11 = scalar_lea.hbm %s668_s2, 1024 }
  0x15   :  { %s35_s8 = sshll.u32 %s547_s7, 4  ;;  %p449_p8 = scmp.ne.s32.totalorder %s668_s2, %s448_s11  ;;  %s36_s8 = int_to_ptr.vmem [resolvable:$true] %s35_s8 }
  0x16   :  { %p452_p9 = scmp.lt.u32.totalorder %s448_s11, %s668_s2 }
  0x18   :  { %p454_p10 = pnand %p452_p9, %p449_p8 }
  0x1a   :  { %457 = shalt.err (!%p454_p10)
}
  0x1b   :  { %s458_s16 = scalar_lea.vmem %s36_s8, 1024  ;;  %p463_p12 = scmp.lt.s32.totalorder %s36_s8, %s36_s8 }
  0x1c   :  { %p459_p11 = scmp.ne.s32.totalorder %s36_s8, %s458_s16  ;;  %p464_p13 = scmp.lt.s32.totalorder %s458_s16, %s458_s16 }
  0x1e   :  { %p465_p0 = por %p464_p13, %p463_p12 }
  0x20   :  { %p466_p1 = pnand %p465_p0, %p459_p11 }
  0x22   :  { %469 = shalt.err (!%p466_p1)
}
  0x23   :  { %s548_s1 = smov 256   ;;  %s549_s17 = smov 16  }
  0x24   :  { %41 = dma.hbm_to_vmem [thread:$0]  %s668_s2, 1024, %s36_s8, [#allocation7], %s548_s1, %s548_s1, %s549_s17  }
  0x25   :  { %536 = dma.done.wait [#allocation4], 128  }
  0x26   :  { %537 = vsyncadd [#allocation4], 4294967168 }
  0x27   :  { %538 = dma.done.wait [#allocation7], 1024  }
  0x28   :  { %539 = vsyncadd [#allocation7], 4294966272  ;;  %v550_v0 = vmov 0   ;;  %v381_v1 = vld [vmem:[#allocation6 + $0x4] ss:$16 sps:$4 sm:$0xff]   ;;  %v393_v9 = vld [vmem:[#allocation3] sm:$0xff]   ;;  %v194_v10 = vlaneseq }
  0x29   :  { %140 = vmatprep.mubr.bf16.mxu0 %v550_v0  ;;  %183 = vmatprep.mubr.bf16.mxu1 %v550_v0  ;;  %v383_v2 = vld [vmem:[#allocation6 + $0xc] ss:$16 sps:$4 sm:$0xff]   ;;  %v385_v3 = vld [vmem:[#allocation6] ss:$16 sps:$4 sm:$0xff]   ;;  %v386_v4 = vld [vmem:[#allocation6 + $0x8] ss:$16 sps:$4 sm:$0xff]  }
  0x2a   :  { %108 = vmatprep.subr.bf16.mxu0 %v381_v1  ;;  %151 = vmatprep.subr.bf16.mxu1 %v383_v2  ;;  %v387_v5 = vld [vmem:[#allocation6 + $0x24] ss:$16 sps:$4 sm:$0xff]   ;;  %v389_v6 = vld [vmem:[#allocation6 + $0x2c] ss:$16 sps:$4 sm:$0xff]   ;;  %v391_v7 = vld [vmem:[#allocation6 + $0x20] ss:$16 sps:$4 sm:$0xff]  }
  0x2b   :  { %109 = vmatpush1.bf16.msra.mxu0 %v385_v3  ;;  %152 = vmatpush1.bf16.msra.mxu1 %v386_v4  ;;  %v392_v8 = vld [vmem:[#allocation6 + $0x28] ss:$16 sps:$4 sm:$0xff]   ;;  %vm104_vm0 = vcmask 261120   ;;  %v195_v11 = vand.u32 127, %v194_v10  ;;  %s551_s21 = smov [#allocation8]  }
  0x2c   :  { %110 = vmatprep.subr.bf16.mxu0 %v387_v5  ;;  %153 = vmatprep.subr.bf16.mxu1 %v389_v6  ;;  %s313_s22 = sshll.u32 %s551_s21, 4  ;;  %s314_s22 = int_to_ptr.vmem [resolvable:$true] %s313_s22 }
  0x2d   :  { %v198_v12 = vadd.s32 384, %v195_v11  ;;  %v196_v13 = vadd.s32 128, %v195_v11  ;;  %p475_p3 = scmp.lt.s32.totalorder %s314_s22, %s314_s22 }
  0x2f   :  { %111 = vmatpush1.bf16.msra.mxu0 %v391_v7  ;;  %154 = vmatpush1.bf16.msra.mxu1 %v392_v8  ;;  %v370_v14 = vadd.s32 4294967040, %v198_v12  ;;  %vm211_vm1 = vcmp.ge.s32.totalorder %v196_v13, 200 }
  0x31   :  { %vm213_vm2 = vcmp.ge.s32.totalorder %v370_v14, 200 }
  0x32   :  { %366 = vmatmul.mubr.msk.bf16.vlgmr.msra.gmra.mrb[0].mxu0 %vm104_vm0, %v393_v9  ;;  %367 = vmatmul.mubr.msk.bf16.vlgmr.msra.gmra.mrb[0].mxu1 %vm104_vm0, %v393_v9  ;;  %v257_v9 = vstv %s666_s0  ;;  %s470_s0 = scalar_lea.vmem %s314_s22, 512 }
  0x33   :  { %p471_p2 = scmp.ne.s32.totalorder %s314_s22, %s470_s0  ;;  %p476_p4 = scmp.lt.s32.totalorder %s470_s0, %s470_s0 }
  0x35   :  { %p477_p5 = por %p476_p4, %p475_p3 }
  0x37   :  { %p478_p6 = pnand %p477_p5, %p471_p2 }
 0x105   :  { %v142_v15 = vpop.f32.mrb[0].mxu0  ;;  %v185_v16 = vpop.f32.mrb[0].mxu1 }
 0x106   :  { %v144_v17 = vpop.f32.mrb[1].mxu0  ;;  %v187_v18 = vpop.f32.mrb[1].mxu1 }
 0x107   :  { %v215_v19 = vsel %vm211_vm1, -1e+30, %v144_v17  ;;  %v217_v20 = vsel %vm213_vm2, -1e+30, %v187_v18  ;;  %v189_v21 = vpop.f32.mrb[2].mxu1  ;;  %v146_v22 = vpop.f32.mrb[2].mxu0 }
 0x108   :  { %v191_v23 = vpop.f32.mrb[3].mxu1  ;;  %v266_v24 = vmax.f32 %v185_v16, %v217_v20  ;;  %v222_v25 = vmax.f32 %v142_v15, %v215_v19  ;;  %v148_v26 = vpop.f32.mrb[3].mxu0 }
 0x109   :  { %v221_v27 = vsel %vm213_vm2, -1e+30, %v191_v23  ;;  %v219_v28 = vsel %vm211_vm1, -1e+30, %v148_v26 }
 0x10a   :  { %267 = vmax.xlane.f32.xlu0 %v266_v24  ;;  %223 = vmax.xlane.f32.xlu1 %v222_v25  ;;  %v225_v29 = vmax.f32 %v146_v22, %v219_v28  ;;  %v269_v30 = vmax.f32 %v189_v21, %v221_v27 }
 0x10e   :  { %270 = vmax.xlane.f32.xlu0 %v269_v30  ;;  %226 = vmax.xlane.f32.xlu1 %v225_v29 }
 0x197   :  { %v268_v31 = vpop.xlane.xlu0 %267  ;;  %v224_v32 = vpop.xlane.xlu1 %223 }
 0x198   :  { %v272_v33 = vsub.f32 %v185_v16, %v268_v31  ;;  %v273_v34 = vsub.f32 %v217_v20, %v268_v31  ;;  %v228_v35 = vsub.f32 %v142_v15, %v224_v32  ;;  %v229_v36 = vsub.f32 %v215_v19, %v224_v32 }
 0x19a   :  { %v276_v37 = vmul.f32 1.442695, %v272_v33  ;;  %v278_v38 = vmul.f32 1.442695, %v273_v34  ;;  %v232_v39 = vmul.f32 1.442695, %v228_v35 }
 0x19b   :  { %v234_v40 = vmul.f32 1.442695, %v229_v36  ;;  %v271_v41 = vpop.xlane.xlu0 %270  ;;  %v227_v42 = vpop.xlane.xlu1 %226 }
 0x19c   :  { %394 = vpow2.f32 %v276_v37  ;;  %v274_v43 = vsub.f32 %v189_v21, %v271_v41  ;;  %v275_v44 = vsub.f32 %v221_v27, %v271_v41  ;;  %v230_v45 = vsub.f32 %v146_v22, %v227_v42 }
 0x19d   :  { %396 = vpow2.f32 %v278_v38  ;;  %v231_v46 = vsub.f32 %v219_v28, %v227_v42 }
 0x19e   :  { %398 = vpow2.f32 %v232_v39  ;;  %v280_v47 = vmul.f32 1.442695, %v274_v43  ;;  %v282_v48 = vmul.f32 1.442695, %v275_v44  ;;  %v236_v49 = vmul.f32 1.442695, %v230_v45 }
 0x19f   :  { %400 = vpow2.f32 %v234_v40  ;;  %v238_v50 = vmul.f32 1.442695, %v231_v46 }
 0x1a0   :  { %402 = vpow2.f32 %v280_v47 }
 0x1a1   :  { %404 = vpow2.f32 %v282_v48 }
 0x1a2   :  { %406 = vpow2.f32 %v236_v49 }
 0x1a3   :  { %408 = vpow2.f32 %v238_v50 }
 0x1a6   :  { %v395_v51 = vpop.eup %394 }
 0x1a7   :  { %v397_v52 = vpop.eup %396 }
 0x1a8   :  { %v399_v53 = vpop.eup %398  ;;  %v284_v54 = vadd.f32 %v397_v52, %v395_v51 }
 0x1a9   :  { %v401_v55 = vpop.eup %400 }
 0x1aa   :  { %v403_v56 = vpop.eup %402  ;;  %285 = vadd.xlane.f32.xlu0 %v284_v54  ;;  %v240_v59 = vadd.f32 %v401_v55, %v399_v53 }
 0x1ab   :  { %v405_v57 = vpop.eup %404 }
 0x1ac   :  { %v407_v58 = vpop.eup %406  ;;  %v287_v60 = vadd.f32 %v405_v57, %v403_v56 }
 0x1ad   :  { %v409_v61 = vpop.eup %408 }
 0x1ae   :  { %241 = vadd.xlane.f32.xlu0 %v240_v59  ;;  %288 = vadd.xlane.f32.xlu1 %v287_v60  ;;  %v243_v62 = vadd.f32 %v409_v61, %v407_v58 }
 0x1b2   :  { %244 = vadd.xlane.f32.xlu1 %v243_v62 }
 0x237   :  { %v286_v63 = vpop.xlane.xlu0 %285 }
 0x238   :  { %410 = vrcp.f32 %v286_v63 }
 0x23b   :  { %v242_v0 = vpop.xlane.xlu0 %241  ;;  %v289_v1 = vpop.xlane.xlu1 %288 }
 0x23c   :  { %412 = vrcp.f32 %v242_v0 }
 0x23d   :  { %414 = vrcp.f32 %v289_v1 }
 0x23f   :  { %v245_v2 = vpop.xlane.xlu1 %244 }
 0x240   :  { %416 = vrcp.f32 %v245_v2 }
 0x242   :  { %v411_v3 = vpop.eup %410 }
 0x243   :  { %v292_v4 = vmul.f32 %v411_v3, %v395_v51  ;;  %v293_v5 = vmul.f32 %v411_v3, %v397_v52 }
 0x245   :  { %v296_v6 = vmul.f32 1.442695, %v292_v4  ;;  %v298_v7 = vmul.f32 1.442695, %v293_v5 }
 0x246   :  { %v413_v8 = vpop.eup %412 }
 0x247   :  { %v415_v10 = vpop.eup %414  ;;  %418 = vpow2.f32 %v296_v6  ;;  %v248_v11 = vmul.f32 %v413_v8, %v399_v53  ;;  %v249_v12 = vmul.f32 %v413_v8, %v401_v55 }
 0x248   :  { %420 = vpow2.f32 %v298_v7  ;;  %v294_v13 = vmul.f32 %v415_v10, %v403_v56  ;;  %v295_v14 = vmul.f32 %v415_v10, %v405_v57 }
 0x249   :  { %252 = vst [vmem:[#allocation8] sm:$0xff] %v248_v11  ;;  %253 = vst [vmem:[#allocation8 + $0x8] sm:$0xff] %v249_v12  ;;  %v258_v15 = vmul.f32 %v257_v9, %v248_v11  ;;  %v259_v16 = vmul.f32 %v257_v9, %v249_v12 }
 0x24a   :  { %v417_v17 = vpop.eup %416  ;;  %v300_v18 = vmul.f32 1.442695, %v294_v13  ;;  %v302_v19 = vmul.f32 1.442695, %v295_v14 }
 0x24b   :  { %v250_v20 = vmul.f32 %v417_v17, %v407_v58  ;;  %v251_v21 = vmul.f32 %v417_v17, %v409_v61  ;;  %262 = vst [vmem:[#allocation11] sm:$0xff] %v258_v15  ;;  %263 = vst [vmem:[#allocation11 + $0x8] sm:$0xff] %v259_v16 }
 0x24c   :  { %422 = vpow2.f32 %v300_v18 }
 0x24d   :  { %424 = vpow2.f32 %v302_v19  ;;  %254 = vst [vmem:[#allocation8 + $0x10] sm:$0xff] %v250_v20  ;;  %255 = vst [vmem:[#allocation8 + $0x18] sm:$0xff] %v251_v21  ;;  %v260_v22 = vmul.f32 %v257_v9, %v250_v20  ;;  %v261_v23 = vmul.f32 %v257_v9, %v251_v21 }
 0x24e   :  { %481 = shalt.err (!%p478_p6)
}
 0x24f   :  { %s482_s25 = scalar_lea.hbm %s669_s3, 512 }
 0x250   :  { %p483_p7 = scmp.ne.s32.totalorder %s669_s3, %s482_s25  ;;  %p486_p8 = scmp.lt.u32.totalorder %s482_s25, %s669_s3 }
 0x252   :  { %p488_p9 = pnand %p486_p8, %p483_p7 }
 0x254   :  { %491 = shalt.err (!%p488_p9)
}
 0x255   :  { %319 = dma.vmem_to_hbm [thread:$0]  %s314_s22, 512, %s669_s3, [#allocation5], %s548_s1, %s548_s1, %s549_s17   ;;  %264 = vst [vmem:[#allocation11 + $0x10] sm:$0xff] %v260_v22  ;;  %265 = vst [vmem:[#allocation11 + $0x18] sm:$0xff] %v261_v23  ;;  %v419_v24 = vpop.eup %418 }
 0x256   :  { %v421_v25 = vpop.eup %420  ;;  %304 = vst [vmem:[#allocation9] sm:$0xff] %v419_v24  ;;  %s552_s7 = smov [#allocation9]   ;;  %s553_s9 = smov [#allocation11]  }
 0x257   :  { %305 = vst [vmem:[#allocation9 + $0x8] sm:$0xff] %v421_v25  ;;  %s325_s8 = sshll.u32 %s552_s7, 4  ;;  %s337_s10 = sshll.u32 %s553_s9, 4  ;;  %v423_v26 = vpop.eup %422  ;;  %s326_s8 = int_to_ptr.vmem [resolvable:$true] %s325_s8  ;;  %s629_s10 = int_to_ptr.vmem [resolvable:$true] %s337_s10 }
 0x258   :  { %v425_v27 = vpop.eup %424  ;;  %306 = vst [vmem:[#allocation9 + $0x10] sm:$0xff] %v423_v26  ;;  %s492_s11 = scalar_lea.vmem %s326_s8, 512  ;;  %p497_p11 = scmp.lt.s32.totalorder %s326_s8, %s326_s8 }
 0x259   :  { %307 = vst [vmem:[#allocation9 + $0x18] sm:$0xff] %v425_v27  ;;  %p493_p10 = scmp.ne.s32.totalorder %s326_s8, %s492_s11  ;;  %p498_p12 = scmp.lt.s32.totalorder %s492_s11, %s492_s11 }
 0x25b   :  { %p499_p13 = por %p498_p12, %p497_p11 }
 0x25d   :  { %p500_p0 = pnand %p499_p13, %p493_p10 }
 0x25f   :  { %503 = shalt.err (!%p500_p0)
}
 0x260   :  { %s504_s13 = scalar_lea.hbm %s670_s4, 512 }
 0x261   :  { %p505_p1 = scmp.ne.s32.totalorder %s670_s4, %s504_s13  ;;  %p508_p2 = scmp.lt.u32.totalorder %s504_s13, %s670_s4 }
 0x263   :  { %p510_p3 = pnand %p508_p2, %p505_p1 }
 0x265   :  { %513 = shalt.err (!%p510_p3)
}
 0x266   :  { %331 = dma.vmem_to_hbm [thread:$0]  %s326_s8, 512, %s670_s4, [#allocation10], %s548_s1, %s548_s1, %s549_s17  }
 0x267   :  { %s514_s20 = scalar_lea.vmem %s629_s10, 512  ;;  %p519_p5 = scmp.lt.s32.totalorder %s629_s10, %s629_s10 }
 0x268   :  { %p515_p4 = scmp.ne.s32.totalorder %s629_s10, %s514_s20  ;;  %p520_p6 = scmp.lt.s32.totalorder %s514_s20, %s514_s20 }
 0x26a   :  { %p521_p7 = por %p520_p6, %p519_p5 }
 0x26c   :  { %p522_p8 = pnand %p521_p7, %p515_p4 }
 0x26e   :  { %525 = shalt.err (!%p522_p8)
}
 0x26f   :  { %s526_s0 = scalar_lea.hbm %s671_s5, 512 }
 0x270   :  { %p527_p9 = scmp.ne.s32.totalorder %s671_s5, %s526_s0  ;;  %p530_p10 = scmp.lt.u32.totalorder %s526_s0, %s671_s5 }
 0x272   :  { %p532_p11 = pnand %p530_p10, %p527_p9 }
 0x274   :  { %535 = shalt.err (!%p532_p11)
}
 0x275   :  { %343 = dma.vmem_to_hbm [thread:$0]  %s629_s10, 512, %s671_s5, [#allocation10], %s548_s1, %s548_s1, %s549_s17  }
 0x276   :  { %540 = dma.done.wait [#allocation5], 512  }
 0x277   :  { %541 = vsyncadd [#allocation5], 4294966784 }
 0x278   :  { %542 = dma.done.wait [#allocation10], 1024  }
 0x279   :  { %543 = vsyncadd [#allocation10], 4294966272 }
 0x27a   :  { %353 = vsyncpa [#allocation4], 1 }
 0x27b   :  { %354 = vsyncpa [#allocation7], 1 }
 0x27c   :  { %355 = vsyncpa [#allocation5], 1 }
 0x27d   :  { %356 = vsyncpa [#allocation10], 1 }

</bundles_post_ra>
